<compile_context>
chip_gen: v6e
topology: v6e:2x2x1
jax: 0.10.0
libtpu: 0.0.40
codegen_flags: <defaults>
</compile_context>

<pallas_src>
import math
import numpy as np

import jax
import jax.numpy as jnp
from jax import lax
from jax.experimental import pallas as pl
from jax.experimental.pallas import tpu as pltpu


_NEG = -1e30          # masked log-weight for zero-padded points
_OUT_LANES = 128      # lane-dense per-term output row
_MIB = 1024 * 1024


# ----------------------------------------------------------------------------
# VMEM budget: shape- and generation-derived (review item)
# ----------------------------------------------------------------------------
def _vmem_budget(working_set_bytes):
    try:
        info = pltpu.get_tpu_info()
        cap = int(getattr(info, "vmem_capacity_bytes", 64 * _MIB))
    except Exception:
        cap = 64 * _MIB               # conservative: v7x per-TensorCore capacity
    lo = 32 * _MIB
    hi = max(lo, int(0.75 * cap))     # 48 MiB on v7x, 96 MiB on v5e/v6e
    return int(min(max(int(working_set_bytes), lo), hi))


# ----------------------------------------------------------------------------
# In-kernel helpers (traced inside the Pallas kernels)
# ----------------------------------------------------------------------------
def _pairwise_sqdist_t(x, yt):
    """Squared Euclidean distances (m,n) for x:(m,d) and PRE-TRANSPOSED yt:(d,n).

    yt is transposed host-side so the MXU matmul needs no in-kernel XLU
    transpose.  The ||x||^2+||y||^2-2xy expansion loses a little precision for
    near-coincident points vs torch.cdist; acceptable at these scales.
    """
    xy = lax.dot_general(x, yt, (((1,), (0,)), ((), ())),
                         preferred_element_type=jnp.float32)            # (m, n)
    xx = jnp.sum(x * x, axis=1, keepdims=True)                          # (m, 1)
    yy = lax.dot_general(jnp.ones((1, yt.shape[0]), jnp.float32), yt * yt,
                         (((1,), (0,)), ((), ())),
                         preferred_element_type=jnp.float32)            # (1, n)
    return jnp.maximum(xx + yy - 2.0 * xy, 0.0)


def _logsumexp(a, axis):
    m = jnp.max(a, axis=axis, keepdims=True)
    return jnp.log(jnp.sum(jnp.exp(a - m), axis=axis, keepdims=True)) + m


# ----------------------------------------------------------------------------
# Batched Sinkhorn kernel (balanced OT, log-domain, real early exit)
# ----------------------------------------------------------------------------
def _make_sinkhorn_kernel(n_iter, atol, rtol):
    n_iter = int(n_iter)
    atol = float(atol)
    rtol = float(rtol)
    n_pairs = n_iter // 2
    has_tail = (n_iter % 2) == 1

    def kernel(params_ref, x_ref, yt_ref, lxw_ref, lyw_ref, o_ref):
        t = pl.program_id(0)
        eps = params_ref[t, 0]          # SMEM scalar reads
        scale = params_ref[t, 1]        # 1 / (2 * sf^2 * eps)
        logZ = params_ref[t, 2]

        x = x_ref[0]                    # (m, d)
        yt = yt_ref[0]                  # (d, n)   pre-transposed
        lxw = lxw_ref[0]                # (m, 1)   masked log row weights
        lyw = lyw_ref[0]                # (1, n)   masked log col weights

        # single resident (m, n) buffer: log-kernel S = -C/eps - logZ
        S = -(_pairwise_sqdist_t(x, yt) * scale) - logZ                 # (m, n)

        xw = jnp.exp(lxw)               # padded entries underflow to exactly 0
        yw = jnp.exp(lyw)
        yw_inf = jnp.max(yw)            # ||y_w||_inf

        def col_lse(phi):               # (m,1) -> (1,n):   v / psi update
            return _logsumexp(S - (phi - lxw), axis=0)

        def row_lse(psi):               # (1,n) -> (m,1):   u / phi update
            return _logsumexp(S - (psi - lyw), axis=1)

        def one_iter(psi_pre):
            phi_n = row_lse(psi_pre)                   # u-update
            return phi_n, col_lse(phi_n)               # conv check / next v-update

        def converged(psi_used, psi_chk):
            # err = || v * (K^T u_new) - y_w ||_inf, in log form:
            #   v_j (K^T u_new)_j = y_w_j * exp(psi_chk_j - psi_used_j)
            err_vec = jnp.where(yw > 0.0,
                                jnp.abs(yw * (jnp.exp(psi_chk - psi_used) - 1.0)),
                                0.0)
            err = jnp.max(err_vec)
            return jnp.logical_or(err < atol, err < rtol * yw_inf)

        m = x.shape[0]
        n = yt.shape[1]
        phi0 = jnp.zeros((m, 1), jnp.float32)          # u = 1
        psi0 = jnp.zeros((1, n), jnp.float32)          # v = 1

        if n_iter == 0:
            # torch with n_iter == 0: u = v = 1 in obj_dual
            phi_f = row_lse(psi0)
            psi_c = col_lse(phi0)
        else:
            psi_pre0 = col_lse(phi0)                   # first v-update (u = 1)

            if n_pairs > 0:
                def cond(c):
                    return jnp.logical_and(c[0] < n_pairs, c[1] == 0)

                def body(c):
                    _, _, _, psi_pre = c
                    phi_a, chk_a = one_iter(psi_pre)   # iteration 2i
                    phi_b, chk_b = one_iter(chk_a)     # iteration 2i + 1
                    conv = converged(chk_a, chk_b)     # one check per pair
                    return (c[0] + 1, conv.astype(jnp.int32), phi_b, chk_b)

                init = (jnp.array(0, jnp.int32), jnp.array(0, jnp.int32),
                        phi0, psi_pre0)
                _, done, phi_f, psi_c = lax.while_loop(cond, body, init)
            else:
                done = jnp.array(0, jnp.int32)
                phi_f, psi_c = phi0, psi_pre0

            if has_tail:                               # odd n_iter: one guarded step
                def tail(ops):
                    _, psi_pre = ops
                    return one_iter(psi_pre)
                phi_f, psi_c = lax.cond(done == 0, tail, lambda ops: ops,
                                        (phi_f, psi_c))

        # Balanced dual objective (obj_dual with F_indicator_star):
        #   f_cts/eps = phi_f = row_lse(psi_last),  g_cts/eps = psi_c = col_lse(phi_f)
        #   (taken straight from the loop carry -- no finalize LSE sweeps)
        f1 = jnp.sum(phi_f * xw, axis=0, keepdims=True)                 # (1, 1)
        f2 = jnp.sum(psi_c * yw, axis=1, keepdims=True)                 # (1, 1)
        plan = jnp.exp(S - (phi_f - lxw) - (psi_c - lyw))               # (m, n)
        psum = jnp.sum(jnp.sum(plan, axis=1, keepdims=True),
                       axis=0, keepdims=True)                           # (1, 1)
        val = -eps * (f1 + f2 + psum)                                   # (1, 1)
        o_ref[...] = jnp.broadcast_to(val, o_ref.shape)                 # lane-dense

    return kernel


def _batched_sinkhorn_call(kernel, params, xs, ys_t, lxw, lyw, vmem_bytes):
    n_terms, m, d = xs.shape
    n = ys_t.shape[2]
    out = pl.pallas_call(
        kernel,
        grid=(n_terms,),
        in_specs=[
            pl.BlockSpec(memory_space=pltpu.MemorySpace.SMEM),        # per-term scalars
            pl.BlockSpec((1, m, d), lambda t: (t, 0, 0)),             # x points
            pl.BlockSpec((1, d, n), lambda t: (t, 0, 0)),             # y points (d, n)
            pl.BlockSpec((1, m, 1), lambda t: (t, 0, 0)),             # log x weights
            pl.BlockSpec((1, 1, n), lambda t: (t, 0, 0)),             # log y weights
        ],
        out_specs=pl.BlockSpec((1, 1, _OUT_LANES), lambda t: (t, 0, 0)),
        out_shape=jax.ShapeDtypeStruct((n_terms, 1, _OUT_LANES), jnp.float32),
        compiler_params=pltpu.CompilerParams(
            dimension_semantics=("parallel",),          # 2-TC sharding on v7x
            vmem_limit_bytes=vmem_bytes),
    )(params, xs, ys_t, lxw, lyw)
    return out[:, 0, 0]


# ----------------------------------------------------------------------------
# Batched soft-min kernel: FitLoss terms; also reused (grid=(1,)) for
# ConstrainLoss which is exactly FitLoss with row/column roles swapped.
#   term value = -sum_j cw_j * logsumexp_i( -||r_i - c_j||^2 * inv_den + lrw_i )
# ----------------------------------------------------------------------------
def _softmin_kernel(params_ref, r_ref, ct_ref, lrw_ref, cw_ref, o_ref):
    t = pl.program_id(0)
    inv_den = params_ref[t, 0]
    r = r_ref[0]                    # (R, d)  row points (log-weight on rows)
    ct = ct_ref[0]                  # (d, C)  col points, pre-transposed
    lrw = lrw_ref[0]                # (R, 1)  masked log row weights
    cw = cw_ref[0]                  # (1, C)  col weights (0 on padding)
    Cmat = -(_pairwise_sqdist_t(r, ct) * inv_den) + lrw                 # (R, C)
    lse = _logsumexp(Cmat, axis=0)                                      # (1, C)
    val = -jnp.sum(lse * cw, axis=1, keepdims=True)                     # (1, 1)
    o_ref[...] = jnp.broadcast_to(val, o_ref.shape)


def _batched_softmin_call(params, rows, cols_t, lrw, cw, vmem_bytes):
    n_terms, R, d = rows.shape
    C = cols_t.shape[2]
    out = pl.pallas_call(
        _softmin_kernel,
        grid=(n_terms,),
        in_specs=[
            pl.BlockSpec(memory_space=pltpu.MemorySpace.SMEM),
            pl.BlockSpec((1, R, d), lambda t: (t, 0, 0)),
            pl.BlockSpec((1, d, C), lambda t: (t, 0, 0)),
            pl.BlockSpec((1, R, 1), lambda t: (t, 0, 0)),
            pl.BlockSpec((1, 1, C), lambda t: (t, 0, 0)),
        ],
        out_specs=pl.BlockSpec((1, 1, _OUT_LANES), lambda t: (t, 0, 0)),
        out_shape=jax.ShapeDtypeStruct((n_terms, 1, _OUT_LANES), jnp.float32),
        compiler_params=pltpu.CompilerParams(
            dimension_semantics=("parallel",),
            vmem_limit_bytes=vmem_bytes),
    )(params, rows, cols_t, lrw, cw)
    return out[:, 0, 0]


# ----------------------------------------------------------------------------
# TrajLoss port (forward() only)
# ----------------------------------------------------------------------------
class TrajLossPallas:
    """JAX/Pallas port of TrajLoss.forward() (balanced OT, branching_rate_fn=None)."""

    def __init__(self, x0, weights, x_obs, t_idx_obs, dt, tau, chain, sigma, M,
                 lamda_reg, lamda_cst, sigma_cst, sinkhorn_iters,
                 lamda_unbal=None, branching_rate_fn=None, warm_start=False,
                 scale_factors=None, scale_factors_fit=None,
                 scale_factor_global=None, atol=1e-4, rtol=1e-4):
        if lamda_unbal is not None:
            # TODO(synk): unbalanced (KL-relaxed) proxdiv / dual path not implemented.
            raise NotImplementedError("only balanced OT (lamda_unbal=None) implemented")
        if branching_rate_fn is not None:
            # TODO(synk): branching-rate reweighting of PathsLoss not implemented.
            raise NotImplementedError("branching_rate_fn must be None")

        self.T = len(x0)
        self.d = int(x0[0].shape[1])
        self._x_np = [np.asarray(xi, np.float32) for xi in x0]
        self._w_np = [np.asarray(w, np.float32) for w in weights]
        self._x_obs_np = np.asarray(x_obs, np.float32)
        self.t_idx_obs = np.asarray(t_idx_obs)
        _, counts = np.unique(self.t_idx_obs, return_counts=True)
        self.N = counts                                               # obs per time
        self.M = np.asarray(M, dtype=np.int64)                       # latent per time
        self.dt = float(dt)
        self.tau = float(tau)
        self.chain = chain
        self.sigma = float(sigma)
        self.sigma_cst = float(sigma_cst)
        self.lamda_reg = jnp.asarray(lamda_reg, jnp.float32)
        self.lamda_cst = float(lamda_cst)
        self.sinkhorn_iters = int(sinkhorn_iters)
        self.atol = float(atol)
        self.rtol = float(rtol)

        # tia flags + cnt, exactly as in the torch __init__
        self.tia = np.ones(self.T)
        cnt = 0
        for i in range(1, self.T):
            if not i % 2:
                if len(self._w_np[i - 1]) <= len(self._w_np[i]):
                    self.tia[i] = 0
                    cnt += 1
        w = counts.astype(np.float64)
        self.w = (1 + 1 / chain * (len(w) - cnt * 2) / len(w)) / np.sum(self.tia) * w / w

        self.scale_factors = (np.ones(self.T - 1) if scale_factors is None
                              else np.asarray(scale_factors, np.float64))
        self.scale_factors_fit = (np.ones(self.T) if scale_factors_fit is None
                                  else np.asarray(scale_factors_fit, np.float64))
        self.scale_factor_global = (1.0 if scale_factor_global is None
                                    else float(scale_factor_global))

        # everything constant across forward() calls is built once here
        self._sink_kernel = _make_sinkhorn_kernel(self.sinkhorn_iters,
                                                  self.atol, self.rtol)
        self._build_sinkhorn_terms()
        self._build_fit_terms()
        self._build_constrain_term()
        self._lamda_reg_max = jnp.max(self.lamda_reg)

    # ------------------------------------------------------------------ setup
    def _build_sinkhorn_terms(self):
        Thalf = self.T // 2
        terms = []  # (ix, iy, eps, sf, coeff)
        # PathsLoss terms: eps = tau * dt, contribution / dt
        for i in range(Thalf):
            ix = 2 * i if self.tia[2 * i] else 2 * i - 1
            terms.append((ix, 2 * i + 1, self.tau * self.dt,
                          float(self.scale_factors[2 * i]), 1.0 / self.dt))
        # PathsLoss_chain terms: eps = tau / chain, contribution * chain
        for i in range(1, Thalf):
            if self.tia[2 * i]:
                terms.append((2 * i - 1, 2 * i, self.tau / self.chain,
                              float(self.scale_factors[2 * i - 1]), float(self.chain)))
        self._sink_n_terms = len(terms)
        if not terms:
            return

        # Balance the two halves of the ("parallel") term grid across the 2 TCs
        # on v7x: rank by estimated cost and round-robin into halves.
        cost = np.array([float(self.M[ix]) * float(self.M[iy]) / eps
                         for (ix, iy, eps, _, _) in terms])
        order = list(np.argsort(-cost))
        order = order[0::2] + order[1::2]
        terms = [terms[k] for k in order]

        m_max = max(int(self.M[ix]) for (ix, _, _, _, _) in terms)
        n_max = max(int(self.M[iy]) for (_, iy, _, _, _) in terms)
        ns, d = len(terms), self.d
        # TODO(synk): if M varies a lot across time points, bucket terms by size
        #             instead of padding every term to (m_max, n_max).
        xs = np.zeros((ns, m_max, d), np.float32)
        ys_t = np.zeros((ns, d, n_max), np.float32)
        lxw = np.full((ns, m_max, 1), _NEG, np.float32)
        lyw = np.full((ns, 1, n_max), _NEG, np.float32)
        params = np.zeros((ns, 4), np.float32)
        coeffs = []
        for t, (ix, iy, eps, sf, coef) in enumerate(terms):
            mi, ni = int(self.M[ix]), int(self.M[iy])
            xs[t, :mi] = self._x_np[ix]
            ys_t[t, :, :ni] = self._x_np[iy].T
            lxw[t, :mi, 0] = math.log(1.0 / float(mi))
            lyw[t, 0, :ni] = math.log(1.0 / float(ni))
            logZ = math.log((2.0 * math.pi * eps) ** (self.d / 2))
            params[t] = [eps, 1.0 / (2.0 * sf * sf * eps), logZ, 0.0]
            coeffs.append(coef)

        self._sink_x = jnp.asarray(xs)
        self._sink_yt = jnp.asarray(ys_t)
        self._sink_lxw = jnp.asarray(lxw)
        self._sink_lyw = jnp.asarray(lyw)
        self._sink_params = jnp.asarray(params)                       # (ns, 4) SMEM
        self._sink_coeff = jnp.asarray(coeffs, jnp.float32)
        ws = (4 * 4 * m_max * n_max                                   # S + temps
              + 8 * 4 * (m_max * d + d * n_max + m_max + n_max)       # dbl-buffered in
              + 2 * _MIB)
        self._sink_vmem = _vmem_budget(ws)

    def _build_fit_terms(self):
        fit_idx = [i for i in range(self.T) if self.tia[i]]
        self._fit_idx = fit_idx
        self._n_fit = len(fit_idx)
        if not fit_idx:
            return
        obs_by_t = [np.where(self.t_idx_obs == i)[0] for i in range(self.T)]
        d = self.d
        Rf = max(int(self.M[i]) for i in fit_idx)
        Cf = max(len(obs_by_t[i]) for i in fit_idx)
        nf = len(fit_idx)

        rows = np.zeros((nf, Rf, d), np.float32)
        cols_t = np.zeros((nf, d, Cf), np.float32)
        lrw = np.full((nf, Rf, 1), _NEG, np.float32)
        cw = np.zeros((nf, 1, Cf), np.float32)
        params = np.zeros((nf, 1), np.float32)
        for k, i in enumerate(fit_idx):
            idx = obs_by_t[i]
            mi = int(self.M[i])
            rows[k, :mi] = self._x_np[i]
            cols_t[k, :, :len(idx)] = self._x_obs_np[idx].T
            lrw[k, :mi, 0] = math.log(1.0 / float(mi))
            cw[k, 0, :len(idx)] = self._w_np[i]
            params[k, 0] = 1.0 / (2.0 * (float(self.scale_factors_fit[i]) * self.sigma) ** 2)

        self._fit_rows = jnp.asarray(rows)
        self._fit_colsT = jnp.asarray(cols_t)
        self._fit_lrw = jnp.asarray(lrw)
        self._fit_cw = jnp.asarray(cw)
        self._fit_params = jnp.asarray(params)
        self._fit_coeff = (jnp.asarray(self.w[:nf], jnp.float32)
                           / self.lamda_reg[:nf])
        ws = 3 * 4 * Rf * Cf + 8 * 4 * (Rf * d + d * Cf + Rf + Cf) + 2 * _MIB
        self._fit_vmem = _vmem_budget(ws)

    def _build_constrain_term(self):
        # ConstrainLoss as a single role-swapped softmin term in its OWN call
        # (no padding of fit terms to this much larger shape).
        d = self.d
        Msum = int(self.M.sum())
        Nsum = int(self.N.sum())
        x_all = np.concatenate(self._x_np, axis=0)                    # (Msum, d)

        self._cst_rows = jnp.asarray(self._x_obs_np[None])            # (1, Nsum, d)
        self._cst_colsT = jnp.asarray(x_all.T[None])                  # (1, d, Msum)
        self._cst_lrw = jnp.full((1, Nsum, 1), math.log(1.0 / float(Nsum)), jnp.float32)
        self._cst_cw = jnp.full((1, 1, Msum), 1.0 / float(Msum), jnp.float32)
        self._cst_params = jnp.asarray(
            [[1.0 / (2.0 * (self.scale_factor_global * self.sigma_cst) ** 2)]],
            jnp.float32)
        ws = 3 * 4 * Nsum * Msum + 8 * 4 * (Nsum * d + d * Msum + Nsum + Msum) + 2 * _MIB
        self._cst_vmem = _vmem_budget(ws)

    # ---------------------------------------------------------------- forward
    def forward(self):
        reg_total = jnp.float32(0.0)
        if self._sink_n_terms > 0:
            sink_vals = _batched_sinkhorn_call(
                self._sink_kernel, self._sink_params, self._sink_x, self._sink_yt,
                self._sink_lxw, self._sink_lyw, self._sink_vmem)      # (ns,)
            reg_total = jnp.sum(sink_vals * self._sink_coeff)

        fit_total = jnp.float32(0.0)
        if self._n_fit > 0:
            fit_vals = _batched_softmin_call(
                self._fit_params, self._fit_rows, self._fit_colsT,
                self._fit_lrw, self._fit_cw, self._fit_vmem)          # (nf,)
            fit_total = jnp.sum(fit_vals * self._fit_coeff)

        cst = _batched_softmin_call(
            self._cst_params, self._cst_rows, self._cst_colsT,
            self._cst_lrw, self._cst_cw, self._cst_vmem)[0]

        return self._lamda_reg_max * (reg_total + fit_total + self.lamda_cst * cst)

    __call__ = forward


# ----------------------------------------------------------------------------
# Demo
# ----------------------------------------------------------------------------
if __name__ == "__main__":
    key = jax.random.PRNGKey(0)
    T, d = 4, 8
    M = [16, 16, 16, 16]            # latent points per time step (parameters x)
    N_obs = [12, 16, 8, 12]         # observations per time (N[1] > N[2] keeps all tia == 1)

    keys = jax.random.split(key, 3 * T)
    x0 = [0.5 * jax.random.normal(keys[i], (M[i], d), jnp.float32) + 0.1 * i
          for i in range(T)]
    x_obs = jnp.concatenate(
        [0.5 * jax.random.normal(keys[T + i], (N_obs[i], d), jnp.float32) + 0.1 * i
         for i in range(T)], axis=0)
    t_idx_obs = np.concatenate([np.full((N_obs[i],), i, np.int32) for i in range(T)])
    weights = [jax.nn.softmax(jax.random.normal(keys[2 * T + i], (N_obs[i],), jnp.float32))
               for i in range(T)]

    model = TrajLossPallas(
        x0=x0, weights=weights, x_obs=x_obs, t_idx_obs=t_idx_obs,
        dt=0.5, tau=1.0, chain=4, sigma=0.7, M=M,
        lamda_reg=jnp.array([1.0, 2.0, 1.5, 1.0], jnp.float32),
        lamda_cst=0.1, sigma_cst=1.0, sinkhorn_iters=10)

    out = model.forward()
    out = jax.block_until_ready(out)
    assert bool(jnp.isfinite(out)), "TrajLoss output is not finite"
    print("KERNEL_OK")
</pallas_src>

<mosaic_0001>
module attributes {stable_mosaic.version = 11 : i64} {
  func.func @kernel(%arg0: i32, %arg1: memref<3x4xf32, #tpu.memory_space<smem>>, %arg2: memref<1x16x8xf32, #tpu.memory_space<vmem>>, %arg3: memref<1x8x16xf32, #tpu.memory_space<vmem>>, %arg4: memref<1x16x1xf32, #tpu.memory_space<vmem>>, %arg5: memref<1x1x16xf32, #tpu.memory_space<vmem>>, %arg6: memref<1x1x128xf32, #tpu.memory_space<vmem>>) attributes {dimension_semantics = [#tpu.dimension_semantics<parallel>], iteration_bounds = array<i64: 3>, scalar_prefetch = 0 : i64, scratch_operands = 0 : i64, tpu.core_type = #tpu.core_type<tc>, window_params = [{transform_indices = @transform_0, window_bounds = array<i64: 3, 4>}, {transform_indices = @transform_1, window_bounds = array<i64: 1, 16, 8>}, {transform_indices = @transform_2, window_bounds = array<i64: 1, 8, 16>}, {transform_indices = @transform_3, window_bounds = array<i64: 1, 16, 1>}, {transform_indices = @transform_4, window_bounds = array<i64: 1, 1, 16>}, {transform_indices = @transform_5, window_bounds = array<i64: 1, 1, 128>}]} {
    %0 = arith.index_cast %arg0 : i32 to index
    %c0 = arith.constant 0 : index
    %1 = memref.load %arg1[%0, %c0] : memref<3x4xf32, #tpu.memory_space<smem>>
    %2 = arith.index_cast %arg0 : i32 to index
    %c1 = arith.constant 1 : index
    %3 = memref.load %arg1[%2, %c1] : memref<3x4xf32, #tpu.memory_space<smem>>
    %4 = arith.index_cast %arg0 : i32 to index
    %c2 = arith.constant 2 : index
    %5 = memref.load %arg1[%4, %c2] : memref<3x4xf32, #tpu.memory_space<smem>>
    %c0_0 = arith.constant 0 : index
    %c0_1 = arith.constant 0 : index
    %c0_2 = arith.constant 0 : index
    %6 = vector.load %arg2[%c0_0, %c0_1, %c0_2] : memref<1x16x8xf32, #tpu.memory_space<vmem>>, vector<1x16x8xf32>
    %7 = vector.shape_cast %6 : vector<1x16x8xf32> to vector<16x8xf32>
    %c0_3 = arith.constant 0 : index
    %c0_4 = arith.constant 0 : index
    %c0_5 = arith.constant 0 : index
    %8 = vector.load %arg3[%c0_3, %c0_4, %c0_5] : memref<1x8x16xf32, #tpu.memory_space<vmem>>, vector<1x8x16xf32>
    %9 = vector.shape_cast %8 : vector<1x8x16xf32> to vector<8x16xf32>
    %c0_6 = arith.constant 0 : index
    %c0_7 = arith.constant 0 : index
    %c0_8 = arith.constant 0 : index
    %10 = vector.load %arg4[%c0_6, %c0_7, %c0_8] : memref<1x16x1xf32, #tpu.memory_space<vmem>>, vector<1x16x1xf32>
    %11 = vector.shape_cast %10 : vector<1x16x1xf32> to vector<16x1xf32>
    %c0_9 = arith.constant 0 : index
    %c0_10 = arith.constant 0 : index
    %c0_11 = arith.constant 0 : index
    %12 = vector.load %arg5[%c0_9, %c0_10, %c0_11] : memref<1x1x16xf32, #tpu.memory_space<vmem>>, vector<1x1x16xf32>
    %13 = vector.shape_cast %12 : vector<1x1x16xf32> to vector<1x16xf32>
    %cst = arith.constant dense<0.000000e+00> : vector<16x16xf32>
    %14 = tpu.matmul %7, %9, %cst {dimension_numbers = #tpu.dot_dimension_numbers<[1], [0], [0], [1], [0, 0, 1, 1], [], []>} : vector<16x8xf32>, vector<8x16xf32>, vector<16x16xf32> -> vector<16x16xf32>
    %15 = arith.mulf %7, %7 : vector<16x8xf32>
    %cst_12 = arith.constant dense<0.000000e+00> : vector<16xf32>
    %16 = vector.multi_reduction <add>, %15, %cst_12 [1] : vector<16x8xf32> to vector<16xf32>
    %17 = vector.shape_cast %16 : vector<16xf32> to vector<16x1xf32>
    %cst_13 = arith.constant 1.000000e+00 : f32
    %18 = vector.broadcast %cst_13 : f32 to vector<1x8xf32>
    %19 = arith.mulf %9, %9 : vector<8x16xf32>
    %cst_14 = arith.constant dense<0.000000e+00> : vector<1x16xf32>
    %20 = tpu.matmul %18, %19, %cst_14 {dimension_numbers = #tpu.dot_dimension_numbers<[1], [0], [0], [1], [0, 0, 1, 1], [], []>} : vector<1x8xf32>, vector<8x16xf32>, vector<1x16xf32> -> vector<1x16xf32>
    %21 = vector.broadcast %17 : vector<16x1xf32> to vector<16x16xf32>
    %22 = vector.broadcast %20 : vector<1x16xf32> to vector<16x16xf32>
    %23 = arith.addf %21, %22 : vector<16x16xf32>
    %cst_15 = arith.constant 2.000000e+00 : f32
    %24 = vector.broadcast %cst_15 : f32 to vector<16x16xf32>
    %25 = arith.mulf %24, %14 : vector<16x16xf32>
    %26 = arith.subf %23, %25 : vector<16x16xf32>
    %cst_16 = arith.constant 0.000000e+00 : f32
    %27 = vector.broadcast %cst_16 : f32 to vector<16x16xf32>
    %28 = arith.maximumf %26, %27 : vector<16x16xf32>
    %29 = vector.broadcast %3 : f32 to vector<16x16xf32>
    %30 = arith.mulf %28, %29 : vector<16x16xf32>
    %cst_17 = arith.constant 0.000000e+00 : f32
    %31 = vector.broadcast %cst_17 : f32 to vector<16x16xf32>
    %32 = arith.subf %31, %30 : vector<16x16xf32>
    %33 = vector.broadcast %5 : f32 to vector<16x16xf32>
    %34 = arith.subf %32, %33 : vector<16x16xf32>
    %35 = math.exp %11 : vector<16x1xf32>
    %36 = math.exp %13 : vector<1x16xf32>
    %37 = vector.shape_cast %36 : vector<1x16xf32> to vector<1x1x16xf32>
    %cst_18 = arith.constant dense<0xFF800000> : vector<1xf32>
    %38 = vector.multi_reduction <maximumf>, %37, %cst_18 [1, 2] : vector<1x1x16xf32> to vector<1xf32>
    %39 = vector.shape_cast %38 : vector<1xf32> to vector<1x1x1xf32>
    %40 = vector.extract %39[0, 0, 0] : f32 from vector<1x1x1xf32>
    %cst_19 = arith.constant 0.000000e+00 : f32
    %41 = vector.broadcast %cst_19 : f32 to vector<16x1xf32>
    %42 = arith.subf %41, %11 : vector<16x1xf32>
    %43 = vector.broadcast %42 : vector<16x1xf32> to vector<16x16xf32>
    %44 = arith.subf %34, %43 : vector<16x16xf32>
    %cst_20 = arith.constant dense<0xFF800000> : vector<16xf32>
    %45 = vector.multi_reduction <maximumf>, %44, %cst_20 [0] : vector<16x16xf32> to vector<16xf32>
    %46 = vector.shape_cast %45 : vector<16xf32> to vector<1x16xf32>
    %47 = vector.broadcast %46 : vector<1x16xf32> to vector<16x16xf32>
    %48 = arith.subf %44, %47 : vector<16x16xf32>
    %49 = math.exp %48 : vector<16x16xf32>
    %cst_21 = arith.constant dense<0.000000e+00> : vector<16xf32>
    %50 = vector.multi_reduction <add>, %49, %cst_21 [0] : vector<16x16xf32> to vector<16xf32>
    %51 = vector.shape_cast %50 : vector<16xf32> to vector<1x16xf32>
    %52 = math.log %51 : vector<1x16xf32>
    %53 = arith.addf %52, %46 : vector<1x16xf32>
    %c0_i32 = arith.constant 0 : i32
    %c0_i32_22 = arith.constant 0 : i32
    %54:4 = scf.while (%arg7 = %c0_i32, %arg8 = %c0_i32_22, %arg9 = %41, %arg10 = %53) : (i32, i32, vector<16x1xf32>, vector<1x16xf32>) -> (i32, i32, vector<16x1xf32>, vector<1x16xf32>) {
      %c5_i32 = arith.constant 5 : i32
      %80 = arith.cmpi slt, %arg7, %c5_i32 : i32
      %c0_i32_31 = arith.constant 0 : i32
      %81 = arith.cmpi eq, %arg8, %c0_i32_31 : i32
      %82 = arith.andi %80, %81 : i1
      scf.condition(%82) %arg7, %arg8, %arg9, %arg10 : i32, i32, vector<16x1xf32>, vector<1x16xf32>
    } do {
    ^bb0(%arg7: i32, %arg8: i32, %arg9: vector<16x1xf32>, %arg10: vector<1x16xf32>):
      %80 = arith.subf %arg10, %13 : vector<1x16xf32>
      %81 = vector.broadcast %80 : vector<1x16xf32> to vector<16x16xf32>
      %82 = arith.subf %34, %81 : vector<16x16xf32>
      %cst_31 = arith.constant dense<0xFF800000> : vector<16xf32>
      %83 = vector.multi_reduction <maximumf>, %82, %cst_31 [1] : vector<16x16xf32> to vector<16xf32>
      %84 = vector.shape_cast %83 : vector<16xf32> to vector<16x1xf32>
      %85 = vector.broadcast %84 : vector<16x1xf32> to vector<16x16xf32>
      %86 = arith.subf %82, %85 : vector<16x16xf32>
      %87 = math.exp %86 : vector<16x16xf32>
      %cst_32 = arith.constant dense<0.000000e+00> : vector<16xf32>
      %88 = vector.multi_reduction <add>, %87, %cst_32 [1] : vector<16x16xf32> to vector<16xf32>
      %89 = vector.shape_cast %88 : vector<16xf32> to vector<16x1xf32>
      %90 = math.log %89 : vector<16x1xf32>
      %91 = arith.addf %90, %84 : vector<16x1xf32>
      %92 = arith.subf %91, %11 : vector<16x1xf32>
      %93 = vector.broadcast %92 : vector<16x1xf32> to vector<16x16xf32>
      %94 = arith.subf %34, %93 : vector<16x16xf32>
      %cst_33 = arith.constant dense<0xFF800000> : vector<16xf32>
      %95 = vector.multi_reduction <maximumf>, %94, %cst_33 [0] : vector<16x16xf32> to vector<16xf32>
      %96 = vector.shape_cast %95 : vector<16xf32> to vector<1x16xf32>
      %97 = vector.broadcast %96 : vector<1x16xf32> to vector<16x16xf32>
      %98 = arith.subf %94, %97 : vector<16x16xf32>
      %99 = math.exp %98 : vector<16x16xf32>
      %cst_34 = arith.constant dense<0.000000e+00> : vector<16xf32>
      %100 = vector.multi_reduction <add>, %99, %cst_34 [0] : vector<16x16xf32> to vector<16xf32>
      %101 = vector.shape_cast %100 : vector<16xf32> to vector<1x16xf32>
      %102 = math.log %101 : vector<1x16xf32>
      %103 = arith.addf %102, %96 : vector<1x16xf32>
      %104 = arith.subf %103, %13 : vector<1x16xf32>
      %105 = vector.broadcast %104 : vector<1x16xf32> to vector<16x16xf32>
      %106 = arith.subf %34, %105 : vector<16x16xf32>
      %cst_35 = arith.constant dense<0xFF800000> : vector<16xf32>
      %107 = vector.multi_reduction <maximumf>, %106, %cst_35 [1] : vector<16x16xf32> to vector<16xf32>
      %108 = vector.shape_cast %107 : vector<16xf32> to vector<16x1xf32>
      %109 = vector.broadcast %108 : vector<16x1xf32> to vector<16x16xf32>
      %110 = arith.subf %106, %109 : vector<16x16xf32>
      %111 = math.exp %110 : vector<16x16xf32>
      %cst_36 = arith.constant dense<0.000000e+00> : vector<16xf32>
      %112 = vector.multi_reduction <add>, %111, %cst_36 [1] : vector<16x16xf32> to vector<16xf32>
      %113 = vector.shape_cast %112 : vector<16xf32> to vector<16x1xf32>
      %114 = math.log %113 : vector<16x1xf32>
      %115 = arith.addf %114, %108 : vector<16x1xf32>
      %116 = arith.subf %115, %11 : vector<16x1xf32>
      %117 = vector.broadcast %116 : vector<16x1xf32> to vector<16x16xf32>
      %118 = arith.subf %34, %117 : vector<16x16xf32>
      %cst_37 = arith.constant dense<0xFF800000> : vector<16xf32>
      %119 = vector.multi_reduction <maximumf>, %118, %cst_37 [0] : vector<16x16xf32> to vector<16xf32>
      %120 = vector.shape_cast %119 : vector<16xf32> to vector<1x16xf32>
      %121 = vector.broadcast %120 : vector<1x16xf32> to vector<16x16xf32>
      %122 = arith.subf %118, %121 : vector<16x16xf32>
      %123 = math.exp %122 : vector<16x16xf32>
      %cst_38 = arith.constant dense<0.000000e+00> : vector<16xf32>
      %124 = vector.multi_reduction <add>, %123, %cst_38 [0] : vector<16x16xf32> to vector<16xf32>
      %125 = vector.shape_cast %124 : vector<16xf32> to vector<1x16xf32>
      %126 = math.log %125 : vector<1x16xf32>
      %127 = arith.addf %126, %120 : vector<1x16xf32>
      %cst_39 = arith.constant 0.000000e+00 : f32
      %128 = vector.broadcast %cst_39 : f32 to vector<1x16xf32>
      %129 = arith.cmpf ogt, %36, %128 : vector<1x16xf32>
      %130 = arith.subf %127, %103 : vector<1x16xf32>
      %131 = math.exp %130 : vector<1x16xf32>
      %cst_40 = arith.constant 1.000000e+00 : f32
      %132 = vector.broadcast %cst_40 : f32 to vector<1x16xf32>
      %133 = arith.subf %131, %132 : vector<1x16xf32>
      %134 = arith.mulf %36, %133 : vector<1x16xf32>
      %135 = math.absf %134 : vector<1x16xf32>
      %cst_41 = arith.constant 0.000000e+00 : f32
      %136 = vector.broadcast %cst_41 : f32 to vector<1x16xf32>
      %137 = arith.select %129, %135, %136 : vector<1x16xi1>, vector<1x16xf32>
      %138 = vector.shape_cast %137 : vector<1x16xf32> to vector<1x1x16xf32>
      %cst_42 = arith.constant dense<0xFF800000> : vector<1xf32>
      %139 = vector.multi_reduction <maximumf>, %138, %cst_42 [1, 2] : vector<1x1x16xf32> to vector<1xf32>
      %140 = vector.shape_cast %139 : vector<1xf32> to vector<1x1x1xf32>
      %141 = vector.extract %140[0, 0, 0] : f32 from vector<1x1x1xf32>
      %cst_43 = arith.constant 9.99999974E-5 : f32
      %142 = arith.cmpf olt, %141, %cst_43 : f32
      %cst_44 = arith.constant 9.99999974E-5 : f32
      %143 = arith.mulf %cst_44, %40 : f32
      %144 = arith.cmpf olt, %141, %143 : f32
      %145 = arith.ori %142, %144 : i1
      %c1_i32 = arith.constant 1 : i32
      %146 = arith.addi %arg7, %c1_i32 : i32
      %147 = arith.extui %145 : i1 to i32
      scf.yield %146, %147, %115, %127 : i32, i32, vector<16x1xf32>, vector<1x16xf32>
    }
    %55 = arith.mulf %54#2, %35 : vector<16x1xf32>
    %cst_23 = arith.constant dense<0.000000e+00> : vector<1xf32>
    %56 = vector.multi_reduction <add>, %55, %cst_23 [0] : vector<16x1xf32> to vector<1xf32>
    %57 = vector.shape_cast %56 : vector<1xf32> to vector<1x1xf32>
    %58 = arith.mulf %54#3, %36 : vector<1x16xf32>
    %cst_24 = arith.constant dense<0.000000e+00> : vector<1xf32>
    %59 = vector.multi_reduction <add>, %58, %cst_24 [1] : vector<1x16xf32> to vector<1xf32>
    %60 = vector.shape_cast %59 : vector<1xf32> to vector<1x1xf32>
    %61 = arith.subf %54#2, %11 : vector<16x1xf32>
    %62 = vector.broadcast %61 : vector<16x1xf32> to vector<16x16xf32>
    %63 = arith.subf %34, %62 : vector<16x16xf32>
    %64 = arith.subf %54#3, %13 : vector<1x16xf32>
    %65 = vector.broadcast %64 : vector<1x16xf32> to vector<16x16xf32>
    %66 = arith.subf %63, %65 : vector<16x16xf32>
    %67 = math.exp %66 : vector<16x16xf32>
    %cst_25 = arith.constant dense<0.000000e+00> : vector<16xf32>
    %68 = vector.multi_reduction <add>, %67, %cst_25 [1] : vector<16x16xf32> to vector<16xf32>
    %69 = vector.shape_cast %68 : vector<16xf32> to vector<16x1xf32>
    %cst_26 = arith.constant dense<0.000000e+00> : vector<1xf32>
    %70 = vector.multi_reduction <add>, %69, %cst_26 [0] : vector<16x1xf32> to vector<1xf32>
    %71 = vector.shape_cast %70 : vector<1xf32> to vector<1x1xf32>
    %cst_27 = arith.constant 0.000000e+00 : f32
    %72 = arith.subf %cst_27, %1 : f32
    %73 = arith.addf %57, %60 : vector<1x1xf32>
    %74 = arith.addf %73, %71 : vector<1x1xf32>
    %75 = vector.broadcast %72 : f32 to vector<1x1xf32>
    %76 = arith.mulf %75, %74 : vector<1x1xf32>
    %77 = vector.shape_cast %76 : vector<1x1xf32> to vector<1x1x1xf32>
    %78 = vector.broadcast %77 : vector<1x1x1xf32> to vector<1x1x128xf32>
    %c0_28 = arith.constant 0 : index
    %c0_29 = arith.constant 0 : index
    %c0_30 = arith.constant 0 : index
    %79 = vector.load %arg6[%c0_28, %c0_29, %c0_30] : memref<1x1x128xf32, #tpu.memory_space<vmem>>, vector<1x1x128xf32>
    tpu.vector_store %arg6[%c0_28, %c0_29, %c0_30], %78 {strides = array<i32>} : memref<1x1x128xf32, #tpu.memory_space<vmem>>, vector<1x1x128xf32>,
    return
  }
  func.func @transform_0(%arg0: i32) -> (i32, i32) {
    %c0_i32 = arith.constant 0 : i32
    %c0_i32_0 = arith.constant 0 : i32
    %c0_i32_1 = arith.constant 0 : i32
    return %c0_i32, %c0_i32_0 : i32, i32
  }
  func.func @transform_1(%arg0: i32) -> (i32, i32, i32) {
    %c0_i32 = arith.constant 0 : i32
    %c0_i32_0 = arith.constant 0 : i32
    %c0_i32_1 = arith.constant 0 : i32
    return %arg0, %c0_i32, %c0_i32_0 : i32, i32, i32
  }
  func.func @transform_2(%arg0: i32) -> (i32, i32, i32) {
    %c0_i32 = arith.constant 0 : i32
    %c0_i32_0 = arith.constant 0 : i32
    %c0_i32_1 = arith.constant 0 : i32
    return %arg0, %c0_i32, %c0_i32_0 : i32, i32, i32
  }
  func.func @transform_3(%arg0: i32) -> (i32, i32, i32) {
    %c0_i32 = arith.constant 0 : i32
    %c0_i32_0 = arith.constant 0 : i32
    %c0_i32_1 = arith.constant 0 : i32
    return %arg0, %c0_i32, %c0_i32_0 : i32, i32, i32
  }
  func.func @transform_4(%arg0: i32) -> (i32, i32, i32) {
    %c0_i32 = arith.constant 0 : i32
    %c0_i32_0 = arith.constant 0 : i32
    %c0_i32_1 = arith.constant 0 : i32
    return %arg0, %c0_i32, %c0_i32_0 : i32, i32, i32
  }
  func.func @transform_5(%arg0: i32) -> (i32, i32, i32) {
    %c0_i32 = arith.constant 0 : i32
    %c0_i32_0 = arith.constant 0 : i32
    %c0_i32_1 = arith.constant 0 : i32
    return %arg0, %c0_i32, %c0_i32_0 : i32, i32, i32
  }
}

</mosaic_0001>

<bundles_post_ra>
// kernel: tpu_custom_call.1
= control target key start
LH: loop header
LB: loop body
LE: loop exit
PB: predicated region body
PF: predicated region fallthrough
CT: control target
= control target key end

     0   :  { %10 = vsyncpa [#allocation4], 0  ;;  %s1468_s0 = inlined_call_operand.vmem [shape: f32[3,4], index: 0, kind: input, shape index: {}]   ;;  %s1469_s1 = inlined_call_operand.vmem [shape: f32[3,16,8], index: 1, kind: input, shape index: {}]   ;;  %s1470_s2 = inlined_call_operand.vmem [shape: f32[3,8,16], index: 2, kind: input, shape index: {}]   ;;  %s1471_s3 = inlined_call_operand.vmem [shape: f32[3,16,1], index: 3, kind: input, shape index: {}]   ;;  %s1472_s4 = inlined_call_operand.vmem [shape: f32[3,1,16], index: 4, kind: input, shape index: {}]   ;;  %s1473_s5 = inlined_call_operand.hbm [shape: f32[3,1,128], index: 5, kind: output, shape index: {}]  }
   0x1   :  { %11 = vsyncpa [#allocation3], 0 }
   0x2   :  { %13 = vsyncpa [#allocation3 + $0x1], 0  ;;  %s1214_s18 = smov 0   ;;  %s1216_s19 = smov 0  }
   0x3   :  { %s1218_s20 = smov 0   ;;  %s1220_s21 = smov 0  }
   0x4 LB: > { %s1235_s22 = sadd.s32 4294967295, %s1167_s21   ;;  %s917_s23 = sadd.s32 4294967294, %s1167_s21   ;;  %s1167_s21 = sphi %s1220_s21, %s1481_s21   ;;  %s1163_s20 = sphi %s1218_s20, %s1480_s20   ;;  %s1159_s19 = sphi %s1216_s19, %s1479_s19   ;;  %s1155_s18 = sphi %s1214_s18, %s1478_s18  }
   0x5   : > { %s1239_s24 = sadd.s32 1, %s1167_s21   ;;  %s151_s25 = sadd.s32 1, %s1163_s20 }
   0x6   : > { %s148_s26 = ssub.s32 %s1167_s21, %s1239_s24  ;;  %p161_p0 = scmp.ne.s32.totalorder %s1163_s20, %s1159_s19 }
   0x7   : > { %p149_p1 = scmp.eq.s32.totalorder %s148_s26, 0  ;;  %p162_p2 = scmp.eq.s32.totalorder %s1235_s22, 2 }
   0x8   : > { %p167_p3 = scmp.ne.s32.totalorder %s1159_s19, %s1155_s18  ;;  %p168_p4 = scmp.eq.s32.totalorder %s917_s23, 2 }
   0x9   : > { %s1250_s27 = scalar_select %p149_p1, %s1163_s20, %s151_s25  }
   0xa   : > { %p1252_p5 = por %p162_p2, %p161_p0  ;;  %p1256_p6 = por %p168_p4, %p167_p3 }
   0xb   : > { %p918_p7 = scmp.ge.s32.totalorder %s1167_s21, 1  ;;  %p175_p8 = scmp.lt.s32.totalorder %s1167_s21, 4 }
   0xc   : > { %p971_p9 = scmp.eq.s32.totalorder %s1235_s22, 0  ;;  %s188_s8 = sshll.u32 %s1468_s0, 4  ;;  %s189_s8 = int_to_ptr.vmem [resolvable:$true] %s188_s8 }
   0xd   : > { %p1263_p10 = pnand %p918_p7, %p175_p8  ;;  %s1080_s9 = scalar_lea.vmem %s189_s8, 64 }
   0xe   : > { %p1081_p13 = scmp.ne.s32.totalorder %s189_s8, %s1080_s9  ;;  %p1088_p3 = scmp.lt.s32.totalorder %s189_s8, %s189_s8 }
   0xf   : > { %p963_p11 = pneg %p1263_p10  ;;  %p1089_p4 = scmp.lt.s32.totalorder %s1080_s9, %s1080_s9 }
  0x11   : > { %p964_p12 = pnand %p971_p9, %p963_p11  ;;  %p1090_p7 = por %p1089_p4, %p1088_p3 }
  0x13   : > { %p1082_p0 = pneg %p964_p12 }
  0x15   : > { %p1083_p1 = pnand %p1082_p0, %p1081_p13 }
  0x17   : > { %p1084_p2 = pneg %p1083_p1 }
  0x19   : > { %p1091_p8 = pnand %p1090_p7, %p1084_p2 }
  0x1b   : > { %1094 = shalt.err (!%p1091_p8)
}
  0x1c   : > { %s1177_s10 = smov [#allocation2]   ;;  %230 = sbr.rel (%p1263_p10) target bundleno = 2037 (0x7f5), region = 40 }
  0x1d   : > { %966 = dma.vmem_to_smem (!%p964_p12), %s189_s8, 64, %s1177_s10, [#allocation4]  }
  0x21   : > { %1146 = dma.done.wait (%p971_p9), [#allocation4], 64  }
  0x22   : > { %1148 = vsyncadd (%p971_p9), [#allocation4], 4294967232 }
  0x23   : > { %236 = sfence }
  0x24   : > { %s268_s11 = sand.u32 1, %s1159_s19   ;;  %p270_p11 = scmp.lt.s32.totalorder %s1235_s22, 2  ;;  %v1178_v0 = vmov 0.0   ;;  %vm1179_vm0 = vmmov 0   ;;  %v1180_v1 = vmov 0   ;;  %vm299_vm1 = vcmask 64512  }
  0x25   : > { %948 = vmatprep.subr.mxu1 %v1178_v0  ;;  %950 = vmatprep.mubr.msk.f32.mxu1 %vm1179_vm0, %v1178_v0  ;;  %v1181_v14 = vmov 1.0   ;;  %vm489_vm2 = vcmask 122880   ;;  %v463_v30 = vlaneseq  ;;  %vm514_vm3 = vcmask 130048  }
  0x26   : > { %s271_s12 = scalar_select %p270_p11, %s1235_s22, 2  ;;  %1029 = vset.pattern.permute.xlu0 %v1180_v1  ;;  %1028 = vset.pattern.permute.xlu1 %v1180_v1 }
  0x27   : > { %v464_v31 = vshrl.u32 %v463_v30, 7 }
  0x28   : > { %s925_s13 = sshll.u32 %s271_s12, 3  ;;  %s286_s16 = scalar_lea.vmem %s1472_s4, %s271_s12 }
  0x29   : > { %s278_s25 = scalar_lea.vmem %s1470_s2, %s925_s13  ;;  %v1291_v2 = vld [vmem:[%s286_s16] sm:$0x1]  ;;  %s936_s26 = sshll.u32 %s271_s12, 4  ;;  %v1324_v33 = vsub.s32 0, %v464_v31 }
  0x2a   : > { %v295_v3 = vld [vmem:[%s278_s25] sm:$0xff]  ;;  %v487_v4 = vmul.f32 1.442695, %v1291_v2  ;;  %s274_s7 = scalar_lea.vmem %s1469_s1, %s936_s26  ;;  %s283_s10 = scalar_lea.vmem %s1471_s3, %s936_s26 }
  0x2b   : > { %943 = vmatprep.subr.mxu0 %v295_v3  ;;  %v293_v5 = vld [vmem:[%s274_s7] sm:$0xff]  ;;  %v294_v6 = vld [vmem:[%s274_s7 + $0x8] sm:$0xff]  ;;  %v389_v8 = vmul.f32 %v295_v3, %v295_v3  ;;  %s928_s12 = sshll.u32 %s1235_s22, 7  ;;  %s1341_s25 = scalar_lea.vmem [#allocation5], %s268_s11 }
  0x2c   : > { %v1300_v7 = vld [vmem:[%s283_s10] sm:$0xff]  ;;  %1030 = vpow2.f32 %v487_v4  ;;  %944 = vmatpush3.msra.mxu0 %v295_v3  ;;  %v1302_v9 = vld [vmem:[%s283_s10 + $0x8] sm:$0xff]  ;;  %945 = vmatprep.mubr.msk.f32.mxu0 %vm299_vm1, %v293_v5  ;;  %v381_v10 = vmul.f32 %v293_v5, %v293_v5  ;;  %v382_v12 = vmul.f32 %v294_v6, %v294_v6  ;;  %s1322_s13 = sld [smem:[#allocation2 + %s928_s12]]  ;;  %s289_s14 = sadd.s32 1, %s928_s12 }
  0x2d   : > { %v483_v11 = vmul.f32 1.442695, %v1300_v7  ;;  %v485_v13 = vmul.f32 1.442695, %v1302_v9  ;;  %946 = vmatmul.mubr.msk.f32.vlgmr.msra.gmra.mxu0 %vm299_vm1, %v294_v6  ;;  %949 = vmatpush3.msra.mxu1 %v389_v8  ;;  %v501_v21 = vsub.f32 0.0, %v1302_v9  ;;  %v500_v22 = vsub.f32 0.0, %v1300_v7 }
  0x2e   : > { %951 = vmatmul.mubr.msk.f32.vlgmr.msra.gmra.mxu1 %vm299_vm1, %v1181_v14  ;;  %v383_v15 = vsel %vm299_vm1, %v381_v10, 0.0  ;;  %v386_v16 = vsel %vm299_vm1, %v382_v12, 0.0  ;;  %s290_s15 = sld [smem:[#allocation2 + %s289_s14]]  ;;  %s291_s16 = sadd.s32 2, %s928_s12 }
  0x2f   : > { %1032 = vpow2.f32 %v483_v11  ;;  %384 = vadd.xlane.f32.xlu0 %v383_v15  ;;  %s292_s17 = sld [smem:[#allocation2 + %s291_s16]]  ;;  %s1345_s26 = smov 0  }
  0x30   : > { %1034 = vpow2.f32 %v485_v13 }
  0x33   : > { %387 = vadd.xlane.f32.xlu0 %v386_v16 }
  0x34   : > { %v475_v46 = vstv %s290_s15 }
  0x35   : > { %v480_v51 = vstv %s292_s17 }
  0x39   : > { %v1311_v17 = vpop.eup %1030 }
  0x3a   : > { %v490_v18 = vsel %vm489_vm2, %v1311_v17, -inf }
  0x3b   : > { %491 = vmax.xlane.f32.xlu1 %v490_v18 }
  0x3c   : > { %v1315_v19 = vpop.eup %1032 }
  0x3d   : > { %v1317_v20 = vpop.eup %1034 }
  0x49   : > { %509 = vperm.xlu0 %1029, %v501_v21  }
  0x4c   : > { %504 = vperm.xlu1 %1028, %v500_v22  }
  0xb8   : > { %v385_v32 = vpop.xlane.xlu0 %384 }
  0xbc   : > { %v388_v36 = vpop.xlane.xlu0 %387 }
  0xc4   : > { %v492_v23 = vpop.xlane.xlu1 %491  ;;  %v510_v55 = vpop.permute.xlu0 %509 }
  0xc5   : > { %v493_v24 = vrot.slane %v492_v23, 4 }
  0xc7   : > { %v494_v25 = vmax.f32 %v492_v23, %v493_v24 }
  0xc8   : > { %v505_v54 = vpop.permute.xlu1 %504 }
  0xc9   : > { %v495_v26 = vrot.slane %v494_v25, 2 }
  0xcb   : > { %v496_v27 = vmax.f32 %v494_v25, %v495_v26 }
  0xcd   : > { %v497_v28 = vrot.slane %v496_v27, 1 }
  0xcf   : > { %v498_v29 = vmax.f32 %v496_v27, %v497_v28 }
  0xd1   : > { %953 = vpush %v498_v29 }
  0xed   : > { %v947_v34 = vpop.f32.mrf.mxu0 }
  0xee   : > { %v459_v35 = vpop.f32.mrf.mxu1  ;;  %v470_v41 = vmul.f32 2.0, %v947_v34 }
  0xef   : > { %v466_v37 = vrot.slane %v459_v35, %v1324_v33  ;;  %v372_v38 = vpop.f32.mrf.mxu0 }
  0xf0   : > { %v469_v39 = vmul.f32 2.0, %v372_v38  ;;  %v952_v40 = vpop.f32.mrf.mxu1 }
  0xf1   : > { %v467_v42 = vadd.f32 %v466_v37, %v385_v32  ;;  %v468_v43 = vadd.f32 %v466_v37, %v388_v36 }
  0xf3   : > { %v471_v44 = vsub.f32 %v467_v42, %v469_v39  ;;  %v472_v45 = vsub.f32 %v468_v43, %v470_v41 }
  0xf5   : > { %v473_v47 = vmax.f32 %v471_v44, 0.0  ;;  %v474_v48 = vmax.f32 %v472_v45, 0.0 }
  0xf7   : > { %v476_v49 = vmul.f32 %v475_v46, %v473_v47  ;;  %v477_v50 = vmul.f32 %v475_v46, %v474_v48 }
  0xf9   : > { %v478_v52 = vsub.f32 0.0, %v476_v49  ;;  %v479_v53 = vsub.f32 0.0, %v477_v50 }
  0xfb   : > { %v1327_v56 = vsub.f32 %v478_v52, %v480_v51  ;;  %v1329_v57 = vsub.f32 %v479_v53, %v480_v51 }
  0xfd   : > { %v512_v58 = vsub.f32 %v1327_v56, %v505_v54  ;;  %v513_v59 = vsub.f32 %v1329_v57, %v510_v55 }
  0xff   : > { %v515_v60 = vsel %vm514_vm3, %v512_v58, -inf  ;;  %v516_v61 = vsel %vm514_vm3, %v513_v59, -inf }
 0x100   : > { %v517_v62 = vmax.f32 %v515_v60, %v516_v61 }
 0x102   : > { %v518_v63 = vrot.slane %v517_v62, 4  ;;  %s1335_s23 = spop %953 }
 0x104   : > { %v519_v0 = vmax.f32 %v517_v62, %v518_v63 }
 0x106   : > { %v520_v3 = vrot.slane %v519_v0, 2 }
 0x108   : > { %v521_v4 = vmax.f32 %v519_v0, %v520_v3 }
 0x10a   : > { %v522_v5 = vrot.slane %v521_v4, 1 }
 0x10c   : > { %v523_v6 = vmax.f32 %v521_v4, %v522_v5 }
 0x10e   : > { %v524_v8 = vsub.f32 %v512_v58, %v523_v6  ;;  %v525_v10 = vsub.f32 %v513_v59, %v523_v6 }
 0x110   : > { %v526_v11 = vmul.f32 1.442695, %v524_v8  ;;  %v528_v12 = vmul.f32 1.442695, %v525_v10 }
 0x112   : > { %1036 = vpow2.f32 %v526_v11 }
 0x113   : > { %1038 = vpow2.f32 %v528_v12 }
 0x11f   : > { %v1037_v13 = vpop.eup %1036 }
 0x120   : > { %v1039_v14 = vpop.eup %1038  ;;  %v530_v15 = vsel %vm514_vm3, %v1037_v13, 0.0 }
 0x121   : > { %v531_v16 = vsel %vm514_vm3, %v1039_v14, 0.0 }
 0x122   : > { %v532_v18 = vadd.f32 %v531_v16, %v530_v15 }
 0x124   : > { %v533_v21 = vrot.slane %v532_v18, 4 }
 0x126   : > { %v534_v22 = vadd.f32 %v533_v21, %v532_v18 }
 0x128   : > { %v535_v23 = vrot.slane %v534_v22, 2 }
 0x12a   : > { %v536_v24 = vadd.f32 %v535_v23, %v534_v22 }
 0x12c   : > { %v537_v25 = vrot.slane %v536_v24, 1 }
 0x12e   : > { %v538_v26 = vadd.f32 %v537_v25, %v536_v24 }
 0x130   : > { %1040 = vlog2.f32 %v538_v26 }
 0x13d   : > { %v1041_v27 = vpop.eup %1040 }
 0x13e   : > { %v540_v28 = vmul.f32 0.6931472, %v1041_v27 }
 0x140   : > { %v541_v29 = vadd.f32 %v540_v28, %v523_v6  }
 0x141 LB: >> { %v554_v30 = vsub.f32 %v1171_v29, %v1291_v2  ;;  %v1182_v47 = vmov 0   ;;  %vm698_vm4 = vcmp.gt.f32.partialorder %v1311_v17, 0.0  ;;  %s720_s26 = sadd.s32 1, %s1175_s26   ;;  %s717_s30 = smul.f32 0.0001, %s1335_s23  ;;  %s1175_s26 = sphi %s1345_s26, %s720_s26   ;;  %v1171_v29 = vphi %v541_v29, %v1477_v29  }
 0x142   : >> { %1042 = vset.pattern.permute.xlu0 %v1182_v47  ;;  %1043 = vset.pattern.permute.xlu1 %v1182_v47  ;;  %p548_p13 = scmp.lt.s32.totalorder %s720_s26, 5 }
 0x143   : >> { %v558_v31 = vrot.slane %v554_v30, %v1324_v33 }
 0x145   : >> { %v559_v32 = vsub.f32 %v1327_v56, %v558_v31  ;;  %v560_v34 = vsub.f32 %v1329_v57, %v558_v31 }
 0x147   : >> { %v561_v35 = vsel %vm514_vm3, %v559_v32, -inf  ;;  %v564_v36 = vsel %vm514_vm3, %v560_v34, -inf }
 0x148   : >> { %562 = vmax.xlane.f32.xlu0 %v561_v35 }
 0x14c   : >> { %565 = vmax.xlane.f32.xlu0 %v564_v36 }
 0x1d1   : >> { %v563_v37 = vpop.xlane.xlu0 %562 }
 0x1d2   : >> { %v567_v38 = vsub.f32 %v559_v32, %v563_v37 }
 0x1d4   : >> { %v569_v39 = vmul.f32 1.442695, %v567_v38 }
 0x1d5   : >> { %v566_v40 = vpop.xlane.xlu0 %565 }
 0x1d6   : >> { %1044 = vpow2.f32 %v569_v39  ;;  %v568_v41 = vsub.f32 %v560_v34, %v566_v40 }
 0x1d8   : >> { %v571_v42 = vmul.f32 1.442695, %v568_v41 }
 0x1da   : >> { %1046 = vpow2.f32 %v571_v42 }
 0x1e3   : >> { %v1045_v43 = vpop.eup %1044 }
 0x1e4   : >> { %v573_v44 = vsel %vm514_vm3, %v1045_v43, 0.0 }
 0x1e5   : >> { %574 = vadd.xlane.f32.xlu1 %v573_v44 }
 0x1e7   : >> { %v1047_v45 = vpop.eup %1046 }
 0x1e8   : >> { %v576_v46 = vsel %vm514_vm3, %v1047_v45, 0.0 }
 0x1e9   : >> { %577 = vadd.xlane.f32.xlu1 %v576_v46 }
 0x26e   : >> { %v575_v48 = vpop.xlane.xlu1 %574 }
 0x26f   : >> { %1048 = vlog2.f32 %v575_v48 }
 0x272   : >> { %v578_v49 = vpop.xlane.xlu1 %577 }
 0x273   : >> { %1050 = vlog2.f32 %v578_v49 }
 0x27c   : >> { %v1049_v50 = vpop.eup %1048 }
 0x27d   : >> { %v580_v51 = vmul.f32 0.6931472, %v1049_v50 }
 0x27f   : >> { %v583_v52 = vadd.f32 %v580_v51, %v563_v37 }
 0x280   : >> { %v1051_v53 = vpop.eup %1050 }
 0x281   : >> { %v582_v54 = vmul.f32 0.6931472, %v1051_v53  ;;  %v585_v55 = vsub.f32 %v583_v52, %v1300_v7 }
 0x283   : >> { %589 = vperm.xlu0 %1042, %v585_v55   ;;  %v584_v58 = vadd.f32 %v582_v54, %v566_v40 }
 0x285   : >> { %v586_v59 = vsub.f32 %v584_v58, %v1302_v9 }
 0x287   : >> { %594 = vperm.xlu1 %1043, %v586_v59  }
 0x2fe   : >> { %v590_v60 = vpop.permute.xlu0 %589 }
 0x2ff   : >> { %v597_v61 = vsub.f32 %v1327_v56, %v590_v60 }
 0x301   : >> { %v599_v0 = vsel %vm514_vm3, %v597_v61, -inf }
 0x302   : >> { %v595_v62 = vpop.permute.xlu1 %594 }
 0x303   : >> { %v598_v63 = vsub.f32 %v1329_v57, %v595_v62 }
 0x305   : >> { %v600_v3 = vsel %vm514_vm3, %v598_v63, -inf }
 0x306   : >> { %v601_v4 = vmax.f32 %v599_v0, %v600_v3 }
 0x308   : >> { %v602_v5 = vrot.slane %v601_v4, 4 }
 0x30a   : >> { %v603_v6 = vmax.f32 %v601_v4, %v602_v5 }
 0x30c   : >> { %v604_v8 = vrot.slane %v603_v6, 2 }
 0x30e   : >> { %v605_v10 = vmax.f32 %v603_v6, %v604_v8 }
 0x310   : >> { %v606_v11 = vrot.slane %v605_v10, 1 }
 0x312   : >> { %v607_v12 = vmax.f32 %v605_v10, %v606_v11 }
 0x314   : >> { %v608_v13 = vsub.f32 %v597_v61, %v607_v12  ;;  %v609_v14 = vsub.f32 %v598_v63, %v607_v12 }
 0x316   : >> { %v610_v15 = vmul.f32 1.442695, %v608_v13  ;;  %v612_v16 = vmul.f32 1.442695, %v609_v14 }
 0x318   : >> { %1052 = vpow2.f32 %v610_v15 }
 0x319   : >> { %1054 = vpow2.f32 %v612_v16 }
 0x325   : >> { %v1053_v18 = vpop.eup %1052 }
 0x326   : >> { %v1055_v21 = vpop.eup %1054  ;;  %v614_v22 = vsel %vm514_vm3, %v1053_v18, 0.0 }
 0x327   : >> { %v615_v23 = vsel %vm514_vm3, %v1055_v21, 0.0 }
 0x328   : >> { %v616_v24 = vadd.f32 %v615_v23, %v614_v22 }
 0x32a   : >> { %v617_v25 = vrot.slane %v616_v24, 4 }
 0x32c   : >> { %v618_v26 = vadd.f32 %v617_v25, %v616_v24 }
 0x32e   : >> { %v619_v27 = vrot.slane %v618_v26, 2 }
 0x330   : >> { %v620_v28 = vadd.f32 %v619_v27, %v618_v26 }
 0x332   : >> { %v621_v29 = vrot.slane %v620_v28, 1 }
 0x334   : >> { %v622_v30 = vadd.f32 %v621_v29, %v620_v28 }
 0x336   : >> { %1056 = vlog2.f32 %v622_v30 }
 0x343   : >> { %v1057_v31 = vpop.eup %1056 }
 0x344   : >> { %v624_v32 = vmul.f32 0.6931472, %v1057_v31 }
 0x346   : >> { %v1367_v34 = vadd.f32 %v624_v32, %v607_v12 }
 0x348   : >> { %v626_v35 = vsub.f32 %v1367_v34, %v1291_v2 }
 0x34a   : >> { %v630_v36 = vrot.slane %v626_v35, %v1324_v33 }
 0x34c   : >> { %v632_v37 = vsub.f32 %v1329_v57, %v630_v36  ;;  %v631_v38 = vsub.f32 %v1327_v56, %v630_v36 }
 0x34e   : >> { %v636_v39 = vsel %vm514_vm3, %v632_v37, -inf  ;;  %v633_v40 = vsel %vm514_vm3, %v631_v38, -inf }
 0x34f   : >> { %637 = vmax.xlane.f32.xlu0 %v636_v39  ;;  %634 = vmax.xlane.f32.xlu1 %v633_v40 }
 0x3d8   : >> { %v638_v41 = vpop.xlane.xlu0 %637  ;;  %v635_v42 = vpop.xlane.xlu1 %634 }
 0x3d9   : >> { %v640_v43 = vsub.f32 %v632_v37, %v638_v41  ;;  %v639_v44 = vsub.f32 %v631_v38, %v635_v42 }
 0x3db   : >> { %v641_v45 = vmul.f32 1.442695, %v639_v44  ;;  %v643_v46 = vmul.f32 1.442695, %v640_v43 }
 0x3dd   : >> { %1058 = vpow2.f32 %v641_v45 }
 0x3de   : >> { %1060 = vpow2.f32 %v643_v46 }
 0x3ea   : >> { %v1059_v47 = vpop.eup %1058 }
 0x3eb   : >> { %v645_v48 = vsel %vm514_vm3, %v1059_v47, 0.0  ;;  %v1061_v49 = vpop.eup %1060 }
 0x3ec   : >> { %646 = vadd.xlane.f32.xlu1 %v645_v48  ;;  %v648_v50 = vsel %vm514_vm3, %v1061_v49, 0.0 }
 0x3f0   : >> { %649 = vadd.xlane.f32.xlu1 %v648_v50 }
 0x475   : >> { %v647_v51 = vpop.xlane.xlu1 %646 }
 0x476   : >> { %1062 = vlog2.f32 %v647_v51 }
 0x479   : >> { %v650_v52 = vpop.xlane.xlu1 %649 }
 0x47a   : >> { %1064 = vlog2.f32 %v650_v52 }
 0x483   : >> { %v1063_v53 = vpop.eup %1062 }
 0x484   : >> { %v652_v54 = vmul.f32 0.6931472, %v1063_v53 }
 0x486   : >> { %v1378_v55 = vadd.f32 %v652_v54, %v635_v42 }
 0x487   : >> { %v1065_v58 = vpop.eup %1064 }
 0x488   : >> { %v654_v59 = vmul.f32 0.6931472, %v1065_v58  ;;  %v1382_v60 = vsub.f32 %v1378_v55, %v1300_v7 }
 0x48a   : >> { %661 = vperm.xlu1 %1043, %v1382_v60   ;;  %v1385_v61 = vadd.f32 %v654_v59, %v638_v41 }
 0x48c   : >> { %v1389_v62 = vsub.f32 %v1385_v61, %v1302_v9 }
 0x48e   : >> { %666 = vperm.xlu0 %1042, %v1389_v62  }
 0x505   : >> { %v662_v63 = vpop.permute.xlu1 %661 }
 0x506   : >> { %v669_v0 = vsub.f32 %v1327_v56, %v662_v63 }
 0x508   : >> { %v671_v5 = vsel %vm514_vm3, %v669_v0, -inf }
 0x509   : >> { %v667_v3 = vpop.permute.xlu0 %666 }
 0x50a   : >> { %v670_v4 = vsub.f32 %v1329_v57, %v667_v3 }
 0x50c   : >> { %v672_v6 = vsel %vm514_vm3, %v670_v4, -inf }
 0x50d   : >> { %v673_v8 = vmax.f32 %v671_v5, %v672_v6 }
 0x50f   : >> { %v674_v10 = vrot.slane %v673_v8, 4 }
 0x511   : >> { %v675_v11 = vmax.f32 %v673_v8, %v674_v10 }
 0x513   : >> { %v676_v12 = vrot.slane %v675_v11, 2 }
 0x515   : >> { %v677_v13 = vmax.f32 %v675_v11, %v676_v12 }
 0x517   : >> { %v678_v14 = vrot.slane %v677_v13, 1 }
 0x519   : >> { %v679_v15 = vmax.f32 %v677_v13, %v678_v14 }
 0x51b   : >> { %v680_v16 = vsub.f32 %v669_v0, %v679_v15  ;;  %v681_v18 = vsub.f32 %v670_v4, %v679_v15 }
 0x51d   : >> { %v682_v21 = vmul.f32 1.442695, %v680_v16  ;;  %v684_v22 = vmul.f32 1.442695, %v681_v18 }
 0x51f   : >> { %1066 = vpow2.f32 %v682_v21 }
 0x520   : >> { %1068 = vpow2.f32 %v684_v22 }
 0x52c   : >> { %v1067_v23 = vpop.eup %1066 }
 0x52d   : >> { %v1069_v24 = vpop.eup %1068  ;;  %v686_v25 = vsel %vm514_vm3, %v1067_v23, 0.0 }
 0x52e   : >> { %v687_v26 = vsel %vm514_vm3, %v1069_v24, 0.0 }
 0x52f   : >> { %v688_v27 = vadd.f32 %v687_v26, %v686_v25 }
 0x531   : >> { %v689_v28 = vrot.slane %v688_v27, 4 }
 0x533   : >> { %v690_v29 = vadd.f32 %v689_v28, %v688_v27 }
 0x535   : >> { %v691_v30 = vrot.slane %v690_v29, 2 }
 0x537   : >> { %v692_v31 = vadd.f32 %v691_v30, %v690_v29 }
 0x539   : >> { %v693_v32 = vrot.slane %v692_v31, 1 }
 0x53b   : >> { %v694_v35 = vadd.f32 %v693_v32, %v692_v31 }
 0x53d   : >> { %1070 = vlog2.f32 %v694_v35 }
 0x54a   : >> { %v1071_v36 = vpop.eup %1070 }
 0x54b   : >> { %v696_v37 = vmul.f32 0.6931472, %v1071_v36 }
 0x54d   : >> { %v697_v38 = vadd.f32 %v696_v37, %v679_v15  }
 0x54f   : >> { %v699_v39 = vsub.f32 %v697_v38, %v1367_v34  ;;  %v1477_v29 = vmov %v697_v38 }
 0x551   : >> { %v700_v40 = vmul.f32 1.442695, %v699_v39 }
 0x553   : >> { %1072 = vpow2.f32 %v700_v40 }
 0x560   : >> { %v1073_v41 = vpop.eup %1072 }
 0x561   : >> { %v932_v42 = vadd.f32 -1.0, %v1073_v41 }
 0x563   : >> { %v703_v43 = vmul.f32 %v1311_v17, %v932_v42 }
 0x565   : >> { %v704_v44 = vand.u32 2147483647, %v703_v43 }
 0x567   : >> { %v705_v45 = vsel %vm698_vm4, %v704_v44, 0.0 }
 0x568   : >> { %v706_v46 = vsel %vm489_vm2, %v705_v45, -inf }
 0x569   : >> { %707 = vmax.xlane.f32.xlu1 %v706_v46 }
 0x5f2   : >> { %v708_v47 = vpop.xlane.xlu1 %707 }
 0x5f3   : >> { %v709_v48 = vrot.slane %v708_v47, 4 }
 0x5f5   : >> { %v710_v49 = vmax.f32 %v708_v47, %v709_v48 }
 0x5f7   : >> { %v711_v50 = vrot.slane %v710_v49, 2 }
 0x5f9   : >> { %v712_v34 = vmax.f32 %v710_v49, %v711_v50 }
 0x5fb   : >> { %v713_v51 = vrot.slane %v712_v34, 1 }
 0x5fd   : >> { %v714_v52 = vmax.f32 %v712_v34, %v713_v51 }
 0x5ff   : >> { %955 = vpush %v714_v52 }
 0x630   : >> { %s956_s6 = spop %955 }
 0x631   : >> { %p716_p9 = scmp.lt.f32.partialorder %s956_s6, 0.0001  ;;  %p718_p10 = scmp.lt.f32.partialorder %s956_s6, %s717_s30 }
 0x633   : >> { %p719_p12 = por %p718_p10, %p716_p9 }
 0x635   : >> { %s721_s7 = scalar_select %p719_p12, 1, 0 }
 0x637   : >> { %p549_p0 = scmp.eq.s32.totalorder %s721_s7, 0 }
 0x639   : >> { %p550_p1 = pnand %p549_p0, %p548_p13 }
 0x63a   : > { %1074 = vset.pattern.permute.xlu0 (%p550_p1), %v1180_v1  ;;  %1075 = vset.pattern.permute.xlu1 (%p550_p1), %v1180_v1  ;;  %v734_v53 = vmul.f32 (%p550_p1), %v1311_v17, %v697_v38  ;;  %v752_v58 = vsub.f32 (%p550_p1), %v697_v38, %v1291_v2  ;;  %vm724_vm5 = vcmask (%p550_p1), 7168   ;;  %s776_s8 = ssub.f32 (%p550_p1), 0.0, %s1322_s13  ;;  %s933_s9 = sshll.u32 (%p550_p1), %s1235_s22, 4 }
 0x63b   : > { %553 = sbr.rel (!%p550_p1) target bundleno = 321 (0x141), region = 96  ;;  %742 = vperm.xlu0 (%p550_p1), %1074, %v1382_v60   ;;  %s800_s10 = sshll.u32 (%p550_p1), %s1341_s25, 4  ;;  %s801_s10 = int_to_ptr.vmem [resolvable:$true] %s800_s10 }
 0x63c   : > { %v735_v54 = vsel (%p550_p1), %vm489_vm2, %v734_v53, 0.0  ;;  %v756_v59 = vrot.slane (%p550_p1), %v752_v58, %v1324_v33  ;;  %v722_v33 = vmul.f32 (%p550_p1), %v1315_v19, %v1378_v55  ;;  %v779_v26 = vstv (%p550_p1), %s776_s8  ;;  %s1430_s15 = scalar_lea.hbm (%p550_p1), %s1473_s5, %s933_s9  ;;  %s788_s13 = scalar_lea.sflag (%p550_p1), [#allocation3], %s268_s11 }
 0x63d   : > { %s1095_s16 = scalar_lea.vmem (%p550_p1), %s801_s10, 16  ;;  %s1183_s17 = smov (%p550_p1), [#allocation5]  }
 0x63e   : > { %p1096_p2 = scmp.ne.s32.totalorder (%p550_p1), %s801_s10, %s1095_s16  ;;  %s1099_s23 = sshll.u32 (%p550_p1), %s1183_s17, 4  ;;  %s1100_s23 = int_to_ptr.vmem [resolvable:$false] %s1099_s23 }
 0x63f   : > { %747 = vperm.xlu0 (%p550_p1), %1074, %v1389_v62   ;;  %s1101_s22 = scalar_lea.vmem (%p550_p1), %s1100_s23, 32  ;;  %p1102_p7 = scmp.lt.s32.totalorder (%p550_p1), %s801_s10, %s1100_s23 }
 0x640   : > { %p1097_p3 = pnand %p1096_p2, %p1252_p5  ;;  %p1103_p8 = scmp.lt.s32.totalorder %s1101_s22, %s1095_s16 }
 0x642   : > { %p1098_p4 = pneg %p1097_p3  ;;  %p1104_p11 = por %p1103_p8, %p1102_p7 }
 0x644   : > { %p1105_p9 = pnand %p1104_p11, %p1098_p4 }
 0x65e   : > { %736 = vadd.xlane.f32.xlu0 %v735_v54 }
 0x6b6   : > { %v743_v63 = vpop.permute.xlu0 %742 }
 0x6b7   : > { %v750_v0 = vsub.f32 %v1327_v56, %v743_v63  ;;  %v723_v56 = vmul.f32 %v1317_v20, %v1385_v61 }
 0x6b9   : > { %v757_v7 = vsub.f32 %v750_v0, %v756_v59  ;;  %v726_v6 = vsel %vm724_vm5, %v723_v56, 0.0 }
 0x6ba   : > { %v748_v9 = vpop.permute.xlu0 %747 }
 0x6bb   : > { %v759_v3 = vmul.f32 1.442695, %v757_v7  ;;  %v751_v1 = vsub.f32 %v1329_v57, %v748_v9  ;;  %v725_v57 = vsel %vm724_vm5, %v722_v33, 0.0 }
 0x6bc   : > { %v727_v8 = vadd.f32 %v726_v6, %v725_v57 }
 0x6bd   : > { %v758_v60 = vsub.f32 %v751_v1, %v756_v59  ;;  %1076 = vpow2.f32 %v759_v3 }
 0x6be   : > { %v728_v10 = vrot.slane %v727_v8, 4 }
 0x6bf   : > { %v761_v62 = vmul.f32 1.442695, %v758_v60 }
 0x6c0   : > { %v729_v11 = vadd.f32 %v728_v10, %v727_v8 }
 0x6c1   : > { %1078 = vpow2.f32 %v761_v62 }
 0x6c2   : > { %v730_v12 = vrot.slane %v729_v11, 2 }
 0x6c4   : > { %v731_v14 = vadd.f32 %v730_v12, %v729_v11 }
 0x6c6   : > { %v732_v21 = vrot.slane %v731_v14, 1 }
 0x6c8   : > { %v733_v22 = vadd.f32 %v732_v21, %v731_v14 }
 0x6ca   : > { %v1077_v17 = vpop.eup %1076 }
 0x6cb   : > { %v763_v4 = vsel %vm514_vm3, %v1077_v17, 0.0 }
 0x6cc   : > { %764 = vadd.xlane.f32.xlu1 %v763_v4 }
 0x6ce   : > { %v1079_v5 = vpop.eup %1078 }
 0x6cf   : > { %v766_v2 = vsel %vm514_vm3, %v1079_v5, 0.0 }
 0x6d0   : > { %767 = vadd.xlane.f32.xlu1 %v766_v2 }
 0x6e7   : > { %v737_v20 = vpop.xlane.xlu0 %736 }
 0x6e8   : > { %v777_v24 = vadd.f32 %v737_v20, %v733_v22 }
 0x755   : > { %v765_v13 = vpop.xlane.xlu1 %764 }
 0x759   : > { %v768_v15 = vpop.xlane.xlu1 %767 }
 0x75a   : > { %v769_v16 = vadd.f32 %v768_v15, %v765_v13 }
 0x75c   : > { %v770_v18 = vrot.slane %v769_v16, 4 }
 0x75e   : > { %v771_v19 = vadd.f32 %v770_v18, %v769_v16 }
 0x760   : > { %v772_v55 = vrot.slane %v771_v19, 2 }
 0x762   : > { %v773_v61 = vadd.f32 %v772_v55, %v771_v19 }
 0x764   : > { %v774_v23 = vrot.slane %v773_v61, 1 }
 0x766   : > { %v775_v25 = vadd.f32 %v774_v23, %v773_v61 }
 0x768   : > { %v778_v27 = vadd.f32 %v777_v24, %v775_v25 }
 0x76a   : > { %v780_v28 = vmul.f32 %v779_v26, %v778_v27 }
 0x76c   : > { %783 = vperm.xlu1 %1075, %v780_v28  }
 0x7e7   : > { %v784_v29 = vpop.permute.xlu1 %783 }
 0x7e8   : > { %786 = vst [vmem:[%s1341_s25] sm:$0x1] %v784_v29 }
 0x7e9   : > { %1108 = shalt.err (!%p1105_p9)
}
 0x7ea   : > { %s1109_s25 = scalar_lea.hbm %s1430_s15, 16  ;;  %s1113_s30 = scalar_lea.hbm %s1473_s5, 48 }
 0x7eb   : > { %p1110_p10 = scmp.ne.s32.totalorder %s1430_s15, %s1109_s25  ;;  %p1114_p0 = scmp.lt.s32.totalorder %s1430_s15, %s1473_s5 }
 0x7ec   : > { %p1115_p1 = scmp.lt.s32.totalorder %s1113_s30, %s1109_s25 }
 0x7ed   : > { %p1111_p12 = pnand %p1110_p10, %p1252_p5 }
 0x7ee   : > { %p1116_p2 = por %p1115_p1, %p1114_p0 }
 0x7ef   : > { %p1112_p13 = pneg %p1111_p12 }
 0x7f1   : > { %p1117_p3 = pnand %p1116_p2, %p1112_p13 }
 0x7f3   : > { %1120 = shalt.err (!%p1117_p3)
}
 0x7f4   : > { %961 = dma.vmem_to_hbm [thread:$0]  (%p1252_p5), %s801_s10, 16, %s1430_s15, %s788_s13  }
 0x7f5 PF: > { %p973_p4 = scmp.ge.s32.totalorder %s1167_s21, 2  ;;  %s812_s8 = sand.u32 1, %s1155_s18  }
 0x7f6   : > { %s813_s9 = scalar_lea.sflag [#allocation3], %s812_s8 }
 0x7f7   : > { %p968_p7 = pnand %p973_p4, %p1256_p6 }
 0x7f9   : > { %p969_p8 = pneg %p968_p7 }
 0x7fb   : > { %1150 = dma.done.wait (%p969_p8), %s813_s9, 16  }
 0x7fc   : > { %1152 = vsyncadd (%p969_p8), %s813_s9, 4294967280  ;;  %p16_p11 = scmp.ge.s32.totalorder %s1239_s24, 5   ;;  %s1478_s18 = smov %s1159_s19 }
 0x7fd   : > { %s1479_s19 = smov %s1163_s20  ;;  %s1480_s20 = smov %s1250_s27 }
 0x7fe   : > { %s1481_s21 = smov %s1239_s24  ;;  %18 = sbr.rel (!%p16_p11) target bundleno = 4 (0x4), region = 107 }
 0x803   :  { %817 = vsyncpa [#allocation3], 1 }
 0x804   :  { %819 = vsyncpa [#allocation3 + $0x1], 1 }
 0x805   :  { %820 = vsyncpa [#allocation4], 1 }
 0x806   :  { %822 = vsyncpa [#allocation4 + $0x1], 1 }

</bundles_post_ra>
